<compile_context>
chip_gen: v7x
topology: tpu7x:2x2x1
jax: 0.10.0
libtpu: 0.0.40
codegen_flags: <defaults>
</compile_context>

<pallas_src>
import jax
import jax.numpy as jnp
from jax.experimental import pallas as pl
from jax.experimental.pallas import tpu as pltpu


def _round_up(x, m):
    return (x + m - 1) // m * m


def _decoder_linear_kernel(z_ref, wt_ref, b_ref, o_ref, acc_ref):
    # z_ref: (tm, tk), wt_ref: (tk, tn), b_ref: (1, tn), o_ref: (tm, tn)
    k = pl.program_id(2)

    @pl.when(k == 0)
    def _init():
        acc_ref[...] = jnp.zeros_like(acc_ref)

    acc_ref[...] += jnp.dot(z_ref[...], wt_ref[...],
                            preferred_element_type=jnp.float32)

    @pl.when(k == pl.num_programs(2) - 1)
    def _finalize():
        o_ref[...] = (acc_ref[...] + b_ref[...]).astype(o_ref.dtype)


def sphere_decoder_linear(z, wt, bias, *, tm=256, tn=256, tk=512):
    """Forward of SphereDecoderLinear.

    z:    (B, latent_dim)
    wt:   (latent_dim, output_dim)  -- decoder weight, pre-transposed ONCE at init
    bias: (output_dim,)
    """
    B, L = z.shape
    Lw, O = wt.shape
    assert L == Lw, "latent_dim mismatch between z and pre-transposed weight"

    # Tile sizes: lane axes multiples of 128 (256 preferred on v6e/v7x MXU),
    # sublane axis multiples of 8; clamp to the padded problem size.
    tm = min(tm, _round_up(B, 8))
    tn = min(tn, _round_up(O, 128))
    tk = min(tk, _round_up(L, 128))

    Bp, Lp, Op = _round_up(B, tm), _round_up(L, tk), _round_up(O, tn)

    # Zero-pad to tile multiples: makes every block (8,128)-divisible and the
    # output store lane-dense (unmasked vst). Zero K rows / N cols contribute
    # nothing; padded output columns/rows are sliced off below.
    if (Bp, Lp) != (B, L):
        z = jnp.pad(z, ((0, Bp - B), (0, Lp - L)))
    if (Lp, Op) != (L, O):
        wt = jnp.pad(wt, ((0, Lp - L), (0, Op - O)))
    b2 = bias.reshape(1, O)
    if Op != O:
        b2 = jnp.pad(b2, ((0, 0), (0, Op - O)))

    grid = (Bp // tm, Op // tn, Lp // tk)

    out = pl.pallas_call(
        _decoder_linear_kernel,
        out_shape=jax.ShapeDtypeStruct((Bp, Op), z.dtype),
        grid_spec=pltpu.PrefetchScalarGridSpec(
            num_scalar_prefetch=0,
            grid=grid,
            in_specs=[
                pl.BlockSpec((tm, tk), lambda i, j, k: (i, k)),   # activations
                pl.BlockSpec((tk, tn), lambda i, j, k: (k, j)),   # weight (L, O)
                pl.BlockSpec((1, tn), lambda i, j, k: (0, j)),    # bias row
            ],
            out_specs=pl.BlockSpec((tm, tn), lambda i, j, k: (i, j)),
            scratch_shapes=[pltpu.VMEM((tm, tn), jnp.float32)],
        ),
        compiler_params=pltpu.CompilerParams(
            dimension_semantics=("parallel", "parallel", "arbitrary"),
            vmem_limit_bytes=32 * 1024 * 1024,   # safe on v7x (64 MiB phys)
        ),
        cost_estimate=pl.CostEstimate(
            flops=2 * Bp * Lp * Op,
            transcendentals=0,
            bytes_accessed=4 * (Bp * Lp + Lp * Op + Bp * Op),
        ),
    )(z, wt, b2)

    if (Bp, Op) != (B, O):
        out = out[:B, :O]
    return out


if __name__ == "__main__":
    latent_dim = 32
    output_dim = 64
    batch = 8

    key = jax.random.PRNGKey(0)
    kz, kw, kb = jax.random.split(key, 3)

    # Deterministic param init mimicking nn.Linear: U(-1/sqrt(in), 1/sqrt(in))
    bound = 1.0 / (latent_dim ** 0.5)
    weight = jax.random.uniform(kw, (output_dim, latent_dim),
                                minval=-bound, maxval=bound, dtype=jnp.float32)
    bias = jax.random.uniform(kb, (output_dim,),
                              minval=-bound, maxval=bound, dtype=jnp.float32)

    # Hoisted out of the per-call path: the decoder weight is kept
    # pre-transposed (latent_dim, output_dim) from init onward.
    wt = jnp.asarray(weight.T)

    z = jax.random.normal(kz, (batch, latent_dim), dtype=jnp.float32)

    fwd = jax.jit(sphere_decoder_linear)
    out = jax.block_until_ready(fwd(z, wt, bias))

    # Reference check in plain JAX (same semantics as nn.Linear forward).
    ref = z @ weight.T + bias
    assert out.shape == (batch, output_dim)
    assert jnp.allclose(out, ref, atol=1e-5, rtol=1e-5)

    print("KERNEL_OK")
</pallas_src>

<mosaic_0001>
module attributes {stable_mosaic.version = 11 : i64} {
  func.func @_decoder_linear_kernel(%arg0: i32, %arg1: i32, %arg2: i32, %arg3: memref<8x128xf32, #tpu.memory_space<vmem>>, %arg4: memref<128x128xf32, #tpu.memory_space<vmem>>, %arg5: memref<1x128xf32, #tpu.memory_space<vmem>>, %arg6: memref<8x128xf32, #tpu.memory_space<vmem>>, %arg7: memref<8x128xf32, #tpu.memory_space<vmem>>) attributes {dimension_semantics = [#tpu.dimension_semantics<parallel>, #tpu.dimension_semantics<parallel>, #tpu.dimension_semantics<arbitrary>], iteration_bounds = array<i64: 1, 1, 1>, scalar_prefetch = 0 : i64, scratch_operands = 1 : i64, tpu.core_type = #tpu.core_type<tc>, window_params = [{transform_indices = @transform_0, window_bounds = array<i64: 8, 128>}, {transform_indices = @transform_1, window_bounds = array<i64: 128, 128>}, {transform_indices = @transform_2, window_bounds = array<i64: 1, 128>}, {transform_indices = @transform_3, window_bounds = array<i64: 8, 128>}]} {
    %c0_i32 = arith.constant 0 : i32
    %0 = arith.cmpi eq, %arg2, %c0_i32 : i32
    %1 = arith.extui %0 : i1 to i32
    %c0_i32_0 = arith.constant 0 : i32
    %2 = arith.cmpi ne, %1, %c0_i32_0 : i32
    scf.if %2 {
      %cst_10 = arith.constant 0.000000e+00 : f32
      %12 = vector.broadcast %cst_10 : f32 to vector<8x128xf32>
      %c0_11 = arith.constant 0 : index
      %c0_12 = arith.constant 0 : index
      %13 = vector.load %arg7[%c0_11, %c0_12] : memref<8x128xf32, #tpu.memory_space<vmem>>, vector<8x128xf32>
      tpu.vector_store %arg7[%c0_11, %c0_12], %12 {strides = array<i32>} : memref<8x128xf32, #tpu.memory_space<vmem>>, vector<8x128xf32>,
    } else {
    }
    %c0 = arith.constant 0 : index
    %c0_1 = arith.constant 0 : index
    %3 = vector.load %arg7[%c0, %c0_1] : memref<8x128xf32, #tpu.memory_space<vmem>>, vector<8x128xf32>
    %c0_2 = arith.constant 0 : index
    %c0_3 = arith.constant 0 : index
    %4 = vector.load %arg3[%c0_2, %c0_3] : memref<8x128xf32, #tpu.memory_space<vmem>>, vector<8x128xf32>
    %c0_4 = arith.constant 0 : index
    %c0_5 = arith.constant 0 : index
    %5 = vector.load %arg4[%c0_4, %c0_5] : memref<128x128xf32, #tpu.memory_space<vmem>>, vector<128x128xf32>
    %cst = arith.constant dense<0.000000e+00> : vector<8x128xf32>
    %6 = tpu.matmul %4, %5, %cst {dimension_numbers = #tpu.dot_dimension_numbers<[1], [0], [0], [1], [0, 0, 1, 1], [], []>} : vector<8x128xf32>, vector<128x128xf32>, vector<8x128xf32> -> vector<8x128xf32>
    %7 = arith.addf %3, %6 : vector<8x128xf32>
    %c0_6 = arith.constant 0 : index
    %c0_7 = arith.constant 0 : index
    %8 = vector.load %arg7[%c0_6, %c0_7] : memref<8x128xf32, #tpu.memory_space<vmem>>, vector<8x128xf32>
    tpu.vector_store %arg7[%c0_6, %c0_7], %7 {strides = array<i32>} : memref<8x128xf32, #tpu.memory_space<vmem>>, vector<8x128xf32>,
    %c0_i32_8 = arith.constant 0 : i32
    %9 = arith.cmpi eq, %arg2, %c0_i32_8 : i32
    %10 = arith.extui %9 : i1 to i32
    %c0_i32_9 = arith.constant 0 : i32
    %11 = arith.cmpi ne, %10, %c0_i32_9 : i32
    scf.if %11 {
      %c0_10 = arith.constant 0 : index
      %c0_11 = arith.constant 0 : index
      %12 = vector.load %arg7[%c0_10, %c0_11] : memref<8x128xf32, #tpu.memory_space<vmem>>, vector<8x128xf32>
      %c0_12 = arith.constant 0 : index
      %c0_13 = arith.constant 0 : index
      %13 = vector.load %arg5[%c0_12, %c0_13] : memref<1x128xf32, #tpu.memory_space<vmem>>, vector<1x128xf32>
      %14 = vector.broadcast %13 : vector<1x128xf32> to vector<8x128xf32>
      %15 = arith.addf %12, %14 : vector<8x128xf32>
      %c0_14 = arith.constant 0 : index
      %c0_15 = arith.constant 0 : index
      %16 = vector.load %arg6[%c0_14, %c0_15] : memref<8x128xf32, #tpu.memory_space<vmem>>, vector<8x128xf32>
      tpu.vector_store %arg6[%c0_14, %c0_15], %15 {strides = array<i32>} : memref<8x128xf32, #tpu.memory_space<vmem>>, vector<8x128xf32>,
    } else {
    }
    return
  }
  func.func @transform_0(%arg0: i32, %arg1: i32, %arg2: i32) -> (i32, i32) {
    %c0_i32 = arith.constant 0 : i32
    return %arg0, %arg2 : i32, i32
  }
  func.func @transform_1(%arg0: i32, %arg1: i32, %arg2: i32) -> (i32, i32) {
    %c0_i32 = arith.constant 0 : i32
    return %arg2, %arg1 : i32, i32
  }
  func.func @transform_2(%arg0: i32, %arg1: i32, %arg2: i32) -> (i32, i32) {
    %c0_i32 = arith.constant 0 : i32
    %c0_i32_0 = arith.constant 0 : i32
    return %c0_i32, %arg1 : i32, i32
  }
  func.func @transform_3(%arg0: i32, %arg1: i32, %arg2: i32) -> (i32, i32) {
    %c0_i32 = arith.constant 0 : i32
    return %arg0, %arg1 : i32, i32
  }
}

</mosaic_0001>

<bundles_post_ra>
// kernel: sphere_decoder_linear.1
= control target key start
LH: loop header
LB: loop body
LE: loop exit
PB: predicated region body
PF: predicated region fallthrough
CT: control target
= control target key end

     0   :  { %v242_v3 = vmov 0.0|0.0   ;;  %vm243_vm0 = vmmov 0   ;;  %v244_v6 = vmov 0.0   ;;  %s332_s0 = inlined_call_operand.vmem [shape: f32[8,128], index: 0, kind: input, shape index: {}]   ;;  %s333_s1 = inlined_call_operand.vmem [shape: f32[128,128], index: 1, kind: input, shape index: {}]   ;;  %s334_s2 = inlined_call_operand.vmem [shape: f32[1,128], index: 2, kind: input, shape index: {}]   ;;  %s335_s3 = inlined_call_operand.hbm [shape: f32[8,128], index: 3, kind: output, shape index: {}]  }
   0x1   :  { %v22_v0 = vld [vmem:[%s333_s1] sm:$0xff]  ;;  %v23_v1 = vld [vmem:[%s333_s1 + $0x8] sm:$0xff]  ;;  %v24_v2 = vld [vmem:[%s333_s1 + $0x10] sm:$0xff]  ;;  %190 = vmatprep.subr.bf16.mxu0 %v242_v3  ;;  %187 = vmatprep.mubr.msk.f32.mxu0 %vm243_vm0, %v244_v6 }
   0x2   :  { %v191_v4 = vpack.c.bf16 %v23_v1, %v22_v0  ;;  %v25_v5 = vld [vmem:[%s333_s1 + $0x18] sm:$0xff]  ;;  %v26_v8 = vld [vmem:[%s333_s1 + $0x20] sm:$0xff]  ;;  %v27_v9 = vld [vmem:[%s333_s1 + $0x28] sm:$0xff] }
   0x3   :  { %v194_v7 = vpack.c.bf16 %v25_v5, %v24_v2 }
   0x4   :  { %192 = vmatpush3.bf16.msra.mxu0 %v191_v4 }
   0x5   :  { %193 = vmatprep.subr.bf16.mxu0 %v242_v3 }
   0x6   :  { %8 = vsyncpa [#allocation4], 0  ;;  %v197_v10 = vpack.c.bf16 %v27_v9, %v26_v8  ;;  %v28_v11 = vld [vmem:[%s333_s1 + $0x30] sm:$0xff]  ;;  %v29_v12 = vld [vmem:[%s333_s1 + $0x38] sm:$0xff]  ;;  %s245_s21 = smov [#allocation3]  }
   0x7   :  { %v200_v13 = vpack.c.bf16 %v29_v12, %v28_v11  ;;  %v30_v14 = vld [vmem:[%s333_s1 + $0x40] sm:$0xff]  ;;  %v31_v15 = vld [vmem:[%s333_s1 + $0x48] sm:$0xff]  ;;  %v32_v17 = vld [vmem:[%s333_s1 + $0x50] sm:$0xff]  ;;  %s129_s22 = sshll.u32 %s245_s21, 4  ;;  %s130_s22 = int_to_ptr.vmem [resolvable:$true] %s129_s22 }
   0x8   :  { %195 = vmatpush3.bf16.msra.mxu0 %v194_v7  ;;  %v203_v16 = vpack.c.bf16 %v31_v15, %v30_v14  ;;  %v33_v18 = vld [vmem:[%s333_s1 + $0x58] sm:$0xff]  ;;  %v34_v20 = vld [vmem:[%s333_s1 + $0x60] sm:$0xff]  ;;  %v35_v21 = vld [vmem:[%s333_s1 + $0x68] sm:$0xff]  ;;  %p223_p1 = scmp.lt.s32.totalorder %s130_s22, %s130_s22 }
   0x9   :  { %196 = vmatprep.subr.bf16.mxu0 %v242_v3  ;;  %v206_v19 = vpack.c.bf16 %v33_v18, %v32_v17  ;;  %v209_v22 = vpack.c.bf16 %v35_v21, %v34_v20  ;;  %v36_v23 = vld [vmem:[%s333_s1 + $0x70] sm:$0xff]  ;;  %v37_v24 = vld [vmem:[%s333_s1 + $0x78] sm:$0xff]  ;;  %v21_v26 = vld [vmem:[%s332_s0] sm:$0xff]  ;;  %s218_s1 = scalar_lea.vmem %s130_s22, 128 }
   0xa   :  { %v212_v25 = vpack.c.bf16 %v37_v24, %v36_v23  ;;  %v137_v27 = vld [vmem:[%s334_s2] ss:$0 sm:$0xff]  ;;  %p219_p0 = scmp.ne.s32.totalorder %s130_s22, %s218_s1  ;;  %p224_p2 = scmp.lt.s32.totalorder %s218_s1, %s218_s1 }
   0xc   :  { %198 = vmatpush3.bf16.msra.mxu0 %v197_v10  ;;  %p225_p3 = por %p224_p2, %p223_p1 }
   0xd   :  { %199 = vmatprep.subr.bf16.mxu0 %v242_v3 }
   0xe   :  { %p226_p4 = pnand %p225_p3, %p219_p0 }
  0x10   :  { %201 = vmatpush3.bf16.msra.mxu0 %v200_v13 }
  0x11   :  { %202 = vmatprep.subr.bf16.mxu0 %v242_v3 }
  0x14   :  { %204 = vmatpush3.bf16.msra.mxu0 %v203_v16 }
  0x15   :  { %205 = vmatprep.subr.bf16.mxu0 %v242_v3 }
  0x18   :  { %207 = vmatpush3.bf16.msra.mxu0 %v206_v19 }
  0x19   :  { %208 = vmatprep.subr.bf16.mxu0 %v242_v3 }
  0x1c   :  { %210 = vmatpush3.bf16.msra.mxu0 %v209_v22 }
  0x1d   :  { %211 = vmatprep.subr.bf16.mxu0 %v242_v3 }
  0x20   :  { %213 = vmatpush3.bf16.msra.mxu0 %v212_v25 }
  0x23   :  { %188 = vmatmul.mubr.f32.vlgmr.msra.gmra.mrb[0].mxu0 %v21_v26 }
  0xf6   :  { %v104_v28 = vpop.f32.mrb[0].mxu0 }
  0xf7   :  { %v121_v29 = vadd.f32 %v137_v27, %v104_v28  ;;  %v189_v30 = vpop.f32.mrb[1].mxu0 }
  0xf9   :  { %122 = vst [vmem:[#allocation3] sm:$0xff] %v121_v29 }
  0xfa   :  { %229 = shalt.err (!%p226_p4)
}
  0xfb   :  { %s230_s24 = scalar_lea.hbm %s335_s3, 128 }
  0xfc   :  { %p231_p5 = scmp.ne.s32.totalorder %s335_s3, %s230_s24  ;;  %p234_p6 = scmp.lt.u32.totalorder %s230_s24, %s335_s3 }
  0xfe   :  { %p236_p7 = pnand %p234_p6, %p231_p5 }
 0x100   :  { %239 = shalt.err (!%p236_p7)
}
 0x101   :  { %132 = dma.vmem_to_hbm [thread:$0]  %s130_s22, 128, %s335_s3, [#allocation4]  }
 0x102   :  { %240 = dma.done.wait [#allocation4], 128  }
 0x103   :  { %241 = vsyncadd [#allocation4], 4294967168 }
 0x104   :  { %136 = vsyncpa [#allocation4], 1 }

</bundles_post_ra>
